<compile_context>
chip_gen: v6e
topology: v6e:2x2x1
jax: 0.10.0
libtpu: 0.0.40
codegen_flags: <defaults>
</compile_context>

<pallas_src>
import functools

import jax
import jax.numpy as jnp
from jax.experimental import pallas as pl
from jax.experimental.pallas import tpu as pltpu

LANE = 128          # lane width (f32 / bf16)
SUBLANE_BF16 = 16   # bf16 packs 16 rows per sublane group
HEAD_PAD = LANE     # head is computed as a lane-dense 128-wide slab...
OUT_COLS = 8        # ...but only 8 f32 columns hit HBM (col 0 = real logit)


def _round_up(x, m):
    return (x + m - 1) // m * m


def _make_activation(name):
    if name == "relu":
        return lambda y: jnp.maximum(y, 0.0)
    if name == "tanh":
        return jnp.tanh
    if name == "sigmoid":
        return jax.nn.sigmoid
    raise ValueError(f"unsupported activation: {name}")


# ----------------------------------------------------------------------------
# Parameter initialization (deterministic, xavier-uniform style)
# ----------------------------------------------------------------------------
def _init_fcnn_params(key, in_dim, num_neurons, num_hidden, classify):
    dims = [in_dim] + [num_neurons] * (1 + num_hidden)
    if classify:
        dims = dims + [1]
    params = []
    for i in range(len(dims) - 1):
        key, kw = jax.random.split(key)
        fan_in, fan_out = dims[i], dims[i + 1]
        limit = (6.0 / (fan_in + fan_out)) ** 0.5
        w = jax.random.uniform(kw, (fan_in, fan_out), jnp.float32, -limit, limit)
        b = jnp.zeros((1, fan_out), jnp.float32)
        params.append((w, b))
    return params, key


def init_joint_model_params(key, feature_size, num_neurons, num_hidden):
    branch_params = []
    for size in feature_size:
        p, key = _init_fcnn_params(key, size, num_neurons, num_hidden,
                                   classify=False)
        branch_params.append(p)
    clf_in = num_neurons * len(feature_size)
    clf_params, key = _init_fcnn_params(key, clf_in, num_neurons, num_hidden,
                                        classify=True)
    return branch_params, clf_params


# ----------------------------------------------------------------------------
# One-time packing: pad / cast / block-diagonalize params, pack inputs.
# Done OUTSIDE the per-call path (no per-inference pad/cast XLA ops).
# ----------------------------------------------------------------------------
def pack_joint_model_params(branch_params, clf_params, feature_size,
                            num_neurons, compute_dtype=jnp.bfloat16):
    """Returns (weights, biases): one (Kin, Kout) bf16 weight and one (1, Kout)
    f32 bias per fused layer.  Branch layers are block-diagonal across
    branches; classifier layer 0 has its rows rearranged into the padded
    branch layout (this replaces torch.cat — identical math).
    Padding is zero-filled so padded activation columns (act(0), e.g. 0.5 for
    sigmoid) are cancelled by the next layer's zero weight rows."""
    n_br = len(branch_params)
    n_pad = _round_up(num_neurons, LANE)
    feat_pads = [_round_up(f, LANE) for f in feature_size]
    k_total = sum(feat_pads)
    width = n_pad * n_br
    n_branch_layers = len(branch_params[0])

    weights, biases = [], []

    # Branch layer 0: block-diagonal (k_total, width).
    w = jnp.zeros((k_total, width), jnp.float32)
    b = jnp.zeros((1, width), jnp.float32)
    row = 0
    for bi, params in enumerate(branch_params):
        w0, b0 = params[0]
        w = w.at[row:row + w0.shape[0],
                 bi * n_pad:bi * n_pad + w0.shape[1]].set(w0)
        b = b.at[:, bi * n_pad:bi * n_pad + b0.shape[1]].set(b0)
        row += feat_pads[bi]
    weights.append(w.astype(compute_dtype))
    biases.append(b)

    # Branch hidden layers: block-diagonal (width, width).
    for li in range(1, n_branch_layers):
        w = jnp.zeros((width, width), jnp.float32)
        b = jnp.zeros((1, width), jnp.float32)
        for bi, params in enumerate(branch_params):
            wl, bl = params[li]
            w = w.at[bi * n_pad:bi * n_pad + wl.shape[0],
                     bi * n_pad:bi * n_pad + wl.shape[1]].set(wl)
            b = b.at[:, bi * n_pad:bi * n_pad + bl.shape[1]].set(bl)
        weights.append(w.astype(compute_dtype))
        biases.append(b)

    # Classifier layer 0: rows rearranged into the padded branch layout.
    w0c, b0c = clf_params[0]
    w = jnp.zeros((width, n_pad), jnp.float32)
    for bi in range(n_br):
        w = w.at[bi * n_pad:bi * n_pad + num_neurons, :w0c.shape[1]].set(
            w0c[bi * num_neurons:(bi + 1) * num_neurons, :])
    b = jnp.zeros((1, n_pad), jnp.float32).at[:, :b0c.shape[1]].set(b0c)
    weights.append(w.astype(compute_dtype))
    biases.append(b)

    # Classifier hidden layers.
    for li in range(1, len(clf_params) - 1):
        wl, bl = clf_params[li]
        w = jnp.zeros((n_pad, n_pad), jnp.float32)
        w = w.at[:wl.shape[0], :wl.shape[1]].set(wl)
        b = jnp.zeros((1, n_pad), jnp.float32).at[:, :bl.shape[1]].set(bl)
        weights.append(w.astype(compute_dtype))
        biases.append(b)

    # Logit head: 128-wide lane-dense slab, only column 0 is real.
    wh, bh = clf_params[-1]
    w = jnp.zeros((n_pad, HEAD_PAD), jnp.float32)
    w = w.at[:wh.shape[0], :wh.shape[1]].set(wh)
    b = jnp.zeros((1, HEAD_PAD), jnp.float32).at[:, :bh.shape[1]].set(bh)
    weights.append(w.astype(compute_dtype))
    biases.append(b)

    return tuple(weights), tuple(biases)


def pack_joint_model_inputs(xs, feature_size, compute_dtype=jnp.bfloat16):
    """Cast + lane-pad + concat the branch inputs into one (B, K_total) bf16
    array.  Done once per batch, outside the jitted forward, so the kernel
    reads the inputs straight from HBM with no extra pad/cast copy per call."""
    feat_pads = [_round_up(f, LANE) for f in feature_size]
    parts = [jnp.pad(x.astype(compute_dtype), ((0, 0), (0, fp - x.shape[1])))
             for x, fp in zip(xs, feat_pads)]
    return jnp.concatenate(parts, axis=1)


# ----------------------------------------------------------------------------
# Fused kernel: whole network = chain of lane-dense matmuls, one batch tile/step
# ----------------------------------------------------------------------------
def _build_joint_kernel(num_layers, activation, compute_dtype, out_cols):
    act = _make_activation(activation)

    def kernel(*refs):
        x_ref = refs[0]
        o_ref = refs[-1]
        h = x_ref[...]
        y = None
        for li in range(num_layers):
            w = refs[1 + 2 * li][...]
            b = refs[2 + 2 * li][...]
            # MXU matmul (bf16 in, f32 acc) + f32 bias add.
            y = jnp.dot(h, w, preferred_element_type=jnp.float32) + b
            if li < num_layers - 1:
                h = act(y).astype(compute_dtype)
        # Narrow f32 store: only `out_cols` lanes hit HBM (16x less writeback
        # than a 128-wide f32 slab); column 0 holds the real logit.
        o_ref[...] = y[:, :out_cols]

    return kernel


# ----------------------------------------------------------------------------
# Wrapper: batch grid, VMEM-resident params, narrow logit output
# ----------------------------------------------------------------------------
@functools.partial(jax.jit,
                   static_argnames=("activation", "tile_b", "out_cols"))
def joint_forward_packed(x_packed, weights, biases, *, activation="relu",
                         tile_b=1024, out_cols=OUT_COLS):
    """x_packed: (B, K_total) bf16 from pack_joint_model_inputs.
    weights/biases: tuples from pack_joint_model_params.
    Returns (B, 1) f32 logits."""
    B, k_total = x_packed.shape
    num_layers = len(weights)
    compute_dtype = x_packed.dtype

    # Batch tile: multiple of 16 sublanes (bf16 packing), capped by the batch.
    tile = _round_up(min(tile_b, _round_up(B, SUBLANE_BF16)), SUBLANE_BF16)
    b_pad = _round_up(B, tile)
    if b_pad != B:
        x_packed = jnp.pad(x_packed, ((0, b_pad - B), (0, 0)))
    grid = (b_pad // tile,)

    operands = [x_packed]
    # Batch-streamed input; params use constant index maps so they stay
    # VMEM-resident across all grid steps.
    # TODO(synk): on v5e, if profiling shows the input DMA exposed at large
    #             tile_b, add pipeline_mode=pl.Buffered(3) to this spec only.
    in_specs = [pl.BlockSpec((tile, k_total), lambda i: (i, 0))]
    for w, b in zip(weights, biases):
        operands += [w, b]
        in_specs += [pl.BlockSpec(w.shape, lambda i: (0, 0)),
                     pl.BlockSpec(b.shape, lambda i: (0, 0))]

    kernel = _build_joint_kernel(num_layers, activation, compute_dtype,
                                 out_cols)

    out = pl.pallas_call(
        kernel,
        out_shape=jax.ShapeDtypeStruct((b_pad, out_cols), jnp.float32),
        grid=grid,
        in_specs=in_specs,
        out_specs=pl.BlockSpec((tile, out_cols), lambda i: (i, 0)),
        compiler_params=pltpu.CompilerParams(
            # Megacore-shard the batch axis on multi-TC parts (v7x).
            dimension_semantics=("parallel",),
            # Above the 32 MiB default scoped limit, below v7x 64 MiB/TC.
            vmem_limit_bytes=48 * 1024 * 1024,
        ),
    )(*operands)

    # Real logits: first B rows, column 0 of the narrow slab.
    return out[:B, :1]


def joint_model_forward(xs, branch_params, clf_params, feature_size,
                        num_neurons, activation="relu", tile_b=1024):
    """Convenience wrapper.  For repeated serving, hoist the two pack_* calls
    out of the loop (as done in __main__)."""
    weights, biases = pack_joint_model_params(
        branch_params, clf_params, feature_size, num_neurons)
    x_packed = pack_joint_model_inputs(xs, feature_size)
    return joint_forward_packed(x_packed, weights, biases,
                                activation=activation, tile_b=tile_b)


# ----------------------------------------------------------------------------
# Pure-JAX reference (same bf16-in / f32-acc numerics, concat version)
# ----------------------------------------------------------------------------
def _ref_forward(xs, branch_params, clf_params, activation="relu",
                 compute_dtype=jnp.bfloat16):
    act = _make_activation(activation)
    feats = []
    for x, params in zip(xs, branch_params):
        h = x.astype(compute_dtype)
        for (w, b) in params:
            y = jnp.dot(h, w.astype(compute_dtype),
                        preferred_element_type=jnp.float32) + b
            h = act(y).astype(compute_dtype)
        feats.append(h)
    h = jnp.concatenate(feats, axis=1)
    for li, (w, b) in enumerate(clf_params):
        y = jnp.dot(h, w.astype(compute_dtype),
                    preferred_element_type=jnp.float32) + b
        if li < len(clf_params) - 1:
            h = act(y).astype(compute_dtype)
        else:
            h = y
    return h


if __name__ == "__main__":
    # Small shapes consistent with the module: 2 feature branches.
    feature_size = [16, 24]
    num_neurons = 32
    num_hidden = 2
    activation = "relu"
    batch = 4

    key = jax.random.PRNGKey(0)
    key, k0, k1 = jax.random.split(key, 3)
    xs = [
        jax.random.normal(k0, (batch, feature_size[0]), jnp.float32),
        jax.random.normal(k1, (batch, feature_size[1]), jnp.float32),
    ]

    branch_params, clf_params = init_joint_model_params(
        key, feature_size, num_neurons, num_hidden)

    # Packing (pad/cast/block-diag) hoisted out of the per-call path.
    weights, biases = pack_joint_model_params(
        branch_params, clf_params, feature_size, num_neurons)
    x_packed = pack_joint_model_inputs(xs, feature_size)

    out = joint_forward_packed(x_packed, weights, biases,
                               activation=activation)
    out = jax.block_until_ready(out)

    ref = _ref_forward(xs, branch_params, clf_params, activation)
    assert out.shape == (batch, 1)
    assert jnp.allclose(out, ref, atol=1e-2, rtol=1e-2), (
        f"mismatch vs reference:\n{out}\nvs\n{ref}")

    print("KERNEL_OK")
</pallas_src>

<mosaic_0001>
module attributes {stable_mosaic.version = 11 : i64} {
  func.func @kernel(%arg0: i32, %arg1: memref<16x256xbf16, #tpu.memory_space<vmem>>, %arg2: memref<256x256xbf16, #tpu.memory_space<vmem>>, %arg3: memref<1x256xf32, #tpu.memory_space<vmem>>, %arg4: memref<256x256xbf16, #tpu.memory_space<vmem>>, %arg5: memref<1x256xf32, #tpu.memory_space<vmem>>, %arg6: memref<256x256xbf16, #tpu.memory_space<vmem>>, %arg7: memref<1x256xf32, #tpu.memory_space<vmem>>, %arg8: memref<256x128xbf16, #tpu.memory_space<vmem>>, %arg9: memref<1x128xf32, #tpu.memory_space<vmem>>, %arg10: memref<128x128xbf16, #tpu.memory_space<vmem>>, %arg11: memref<1x128xf32, #tpu.memory_space<vmem>>, %arg12: memref<128x128xbf16, #tpu.memory_space<vmem>>, %arg13: memref<1x128xf32, #tpu.memory_space<vmem>>, %arg14: memref<128x128xbf16, #tpu.memory_space<vmem>>, %arg15: memref<1x128xf32, #tpu.memory_space<vmem>>, %arg16: memref<16x8xf32, #tpu.memory_space<vmem>>) attributes {dimension_semantics = [#tpu.dimension_semantics<parallel>], iteration_bounds = array<i64: 1>, scalar_prefetch = 0 : i64, scratch_operands = 0 : i64, tpu.core_type = #tpu.core_type<tc>, window_params = [{transform_indices = @transform_0, window_bounds = array<i64: 16, 256>}, {pipeline_mode = #tpu.pipeline_mode<synchronous>, transform_indices = @transform_1, window_bounds = array<i64: 256, 256>}, {pipeline_mode = #tpu.pipeline_mode<synchronous>, transform_indices = @transform_2, window_bounds = array<i64: 1, 256>}, {pipeline_mode = #tpu.pipeline_mode<synchronous>, transform_indices = @transform_3, window_bounds = array<i64: 256, 256>}, {pipeline_mode = #tpu.pipeline_mode<synchronous>, transform_indices = @transform_4, window_bounds = array<i64: 1, 256>}, {pipeline_mode = #tpu.pipeline_mode<synchronous>, transform_indices = @transform_5, window_bounds = array<i64: 256, 256>}, {pipeline_mode = #tpu.pipeline_mode<synchronous>, transform_indices = @transform_6, window_bounds = array<i64: 1, 256>}, {pipeline_mode = #tpu.pipeline_mode<synchronous>, transform_indices = @transform_7, window_bounds = array<i64: 256, 128>}, {pipeline_mode = #tpu.pipeline_mode<synchronous>, transform_indices = @transform_8, window_bounds = array<i64: 1, 128>}, {pipeline_mode = #tpu.pipeline_mode<synchronous>, transform_indices = @transform_9, window_bounds = array<i64: 128, 128>}, {pipeline_mode = #tpu.pipeline_mode<synchronous>, transform_indices = @transform_10, window_bounds = array<i64: 1, 128>}, {pipeline_mode = #tpu.pipeline_mode<synchronous>, transform_indices = @transform_11, window_bounds = array<i64: 128, 128>}, {pipeline_mode = #tpu.pipeline_mode<synchronous>, transform_indices = @transform_12, window_bounds = array<i64: 1, 128>}, {pipeline_mode = #tpu.pipeline_mode<synchronous>, transform_indices = @transform_13, window_bounds = array<i64: 128, 128>}, {pipeline_mode = #tpu.pipeline_mode<synchronous>, transform_indices = @transform_14, window_bounds = array<i64: 1, 128>}, {transform_indices = @transform_15, window_bounds = array<i64: 16, 8>}]} {
    %c0 = arith.constant 0 : index
    %c0_0 = arith.constant 0 : index
    %0 = vector.load %arg1[%c0, %c0_0] : memref<16x256xbf16, #tpu.memory_space<vmem>>, vector<16x256xbf16>
    %c0_1 = arith.constant 0 : index
    %c0_2 = arith.constant 0 : index
    %1 = vector.load %arg2[%c0_1, %c0_2] : memref<256x256xbf16, #tpu.memory_space<vmem>>, vector<256x256xbf16>
    %c0_3 = arith.constant 0 : index
    %c0_4 = arith.constant 0 : index
    %2 = vector.load %arg3[%c0_3, %c0_4] : memref<1x256xf32, #tpu.memory_space<vmem>>, vector<1x256xf32>
    %cst = arith.constant dense<0.000000e+00> : vector<16x256xf32>
    %3 = tpu.matmul %0, %1, %cst {dimension_numbers = #tpu.dot_dimension_numbers<[1], [0], [0], [1], [0, 0, 1, 1], [], []>} : vector<16x256xbf16>, vector<256x256xbf16>, vector<16x256xf32> -> vector<16x256xf32>
    %4 = vector.broadcast %2 : vector<1x256xf32> to vector<16x256xf32>
    %5 = arith.addf %3, %4 : vector<16x256xf32>
    %cst_5 = arith.constant 0.000000e+00 : f32
    %6 = vector.broadcast %cst_5 : f32 to vector<16x256xf32>
    %7 = arith.maximumf %5, %6 : vector<16x256xf32>
    %8 = arith.truncf %7 : vector<16x256xf32> to vector<16x256xbf16>
    %c0_6 = arith.constant 0 : index
    %c0_7 = arith.constant 0 : index
    %9 = vector.load %arg4[%c0_6, %c0_7] : memref<256x256xbf16, #tpu.memory_space<vmem>>, vector<256x256xbf16>
    %c0_8 = arith.constant 0 : index
    %c0_9 = arith.constant 0 : index
    %10 = vector.load %arg5[%c0_8, %c0_9] : memref<1x256xf32, #tpu.memory_space<vmem>>, vector<1x256xf32>
    %cst_10 = arith.constant dense<0.000000e+00> : vector<16x256xf32>
    %11 = tpu.matmul %8, %9, %cst_10 {dimension_numbers = #tpu.dot_dimension_numbers<[1], [0], [0], [1], [0, 0, 1, 1], [], []>} : vector<16x256xbf16>, vector<256x256xbf16>, vector<16x256xf32> -> vector<16x256xf32>
    %12 = vector.broadcast %10 : vector<1x256xf32> to vector<16x256xf32>
    %13 = arith.addf %11, %12 : vector<16x256xf32>
    %cst_11 = arith.constant 0.000000e+00 : f32
    %14 = vector.broadcast %cst_11 : f32 to vector<16x256xf32>
    %15 = arith.maximumf %13, %14 : vector<16x256xf32>
    %16 = arith.truncf %15 : vector<16x256xf32> to vector<16x256xbf16>
    %c0_12 = arith.constant 0 : index
    %c0_13 = arith.constant 0 : index
    %17 = vector.load %arg6[%c0_12, %c0_13] : memref<256x256xbf16, #tpu.memory_space<vmem>>, vector<256x256xbf16>
    %c0_14 = arith.constant 0 : index
    %c0_15 = arith.constant 0 : index
    %18 = vector.load %arg7[%c0_14, %c0_15] : memref<1x256xf32, #tpu.memory_space<vmem>>, vector<1x256xf32>
    %cst_16 = arith.constant dense<0.000000e+00> : vector<16x256xf32>
    %19 = tpu.matmul %16, %17, %cst_16 {dimension_numbers = #tpu.dot_dimension_numbers<[1], [0], [0], [1], [0, 0, 1, 1], [], []>} : vector<16x256xbf16>, vector<256x256xbf16>, vector<16x256xf32> -> vector<16x256xf32>
    %20 = vector.broadcast %18 : vector<1x256xf32> to vector<16x256xf32>
    %21 = arith.addf %19, %20 : vector<16x256xf32>
    %cst_17 = arith.constant 0.000000e+00 : f32
    %22 = vector.broadcast %cst_17 : f32 to vector<16x256xf32>
    %23 = arith.maximumf %21, %22 : vector<16x256xf32>
    %24 = arith.truncf %23 : vector<16x256xf32> to vector<16x256xbf16>
    %c0_18 = arith.constant 0 : index
    %c0_19 = arith.constant 0 : index
    %25 = vector.load %arg8[%c0_18, %c0_19] : memref<256x128xbf16, #tpu.memory_space<vmem>>, vector<256x128xbf16>
    %c0_20 = arith.constant 0 : index
    %c0_21 = arith.constant 0 : index
    %26 = vector.load %arg9[%c0_20, %c0_21] : memref<1x128xf32, #tpu.memory_space<vmem>>, vector<1x128xf32>
    %cst_22 = arith.constant dense<0.000000e+00> : vector<16x128xf32>
    %27 = tpu.matmul %24, %25, %cst_22 {dimension_numbers = #tpu.dot_dimension_numbers<[1], [0], [0], [1], [0, 0, 1, 1], [], []>} : vector<16x256xbf16>, vector<256x128xbf16>, vector<16x128xf32> -> vector<16x128xf32>
    %28 = vector.broadcast %26 : vector<1x128xf32> to vector<16x128xf32>
    %29 = arith.addf %27, %28 : vector<16x128xf32>
    %cst_23 = arith.constant 0.000000e+00 : f32
    %30 = vector.broadcast %cst_23 : f32 to vector<16x128xf32>
    %31 = arith.maximumf %29, %30 : vector<16x128xf32>
    %32 = arith.truncf %31 : vector<16x128xf32> to vector<16x128xbf16>
    %c0_24 = arith.constant 0 : index
    %c0_25 = arith.constant 0 : index
    %33 = vector.load %arg10[%c0_24, %c0_25] : memref<128x128xbf16, #tpu.memory_space<vmem>>, vector<128x128xbf16>
    %c0_26 = arith.constant 0 : index
    %c0_27 = arith.constant 0 : index
    %34 = vector.load %arg11[%c0_26, %c0_27] : memref<1x128xf32, #tpu.memory_space<vmem>>, vector<1x128xf32>
    %cst_28 = arith.constant dense<0.000000e+00> : vector<16x128xf32>
    %35 = tpu.matmul %32, %33, %cst_28 {dimension_numbers = #tpu.dot_dimension_numbers<[1], [0], [0], [1], [0, 0, 1, 1], [], []>} : vector<16x128xbf16>, vector<128x128xbf16>, vector<16x128xf32> -> vector<16x128xf32>
    %36 = vector.broadcast %34 : vector<1x128xf32> to vector<16x128xf32>
    %37 = arith.addf %35, %36 : vector<16x128xf32>
    %cst_29 = arith.constant 0.000000e+00 : f32
    %38 = vector.broadcast %cst_29 : f32 to vector<16x128xf32>
    %39 = arith.maximumf %37, %38 : vector<16x128xf32>
    %40 = arith.truncf %39 : vector<16x128xf32> to vector<16x128xbf16>
    %c0_30 = arith.constant 0 : index
    %c0_31 = arith.constant 0 : index
    %41 = vector.load %arg12[%c0_30, %c0_31] : memref<128x128xbf16, #tpu.memory_space<vmem>>, vector<128x128xbf16>
    %c0_32 = arith.constant 0 : index
    %c0_33 = arith.constant 0 : index
    %42 = vector.load %arg13[%c0_32, %c0_33] : memref<1x128xf32, #tpu.memory_space<vmem>>, vector<1x128xf32>
    %cst_34 = arith.constant dense<0.000000e+00> : vector<16x128xf32>
    %43 = tpu.matmul %40, %41, %cst_34 {dimension_numbers = #tpu.dot_dimension_numbers<[1], [0], [0], [1], [0, 0, 1, 1], [], []>} : vector<16x128xbf16>, vector<128x128xbf16>, vector<16x128xf32> -> vector<16x128xf32>
    %44 = vector.broadcast %42 : vector<1x128xf32> to vector<16x128xf32>
    %45 = arith.addf %43, %44 : vector<16x128xf32>
    %cst_35 = arith.constant 0.000000e+00 : f32
    %46 = vector.broadcast %cst_35 : f32 to vector<16x128xf32>
    %47 = arith.maximumf %45, %46 : vector<16x128xf32>
    %48 = arith.truncf %47 : vector<16x128xf32> to vector<16x128xbf16>
    %c0_36 = arith.constant 0 : index
    %c0_37 = arith.constant 0 : index
    %49 = vector.load %arg14[%c0_36, %c0_37] : memref<128x128xbf16, #tpu.memory_space<vmem>>, vector<128x128xbf16>
    %c0_38 = arith.constant 0 : index
    %c0_39 = arith.constant 0 : index
    %50 = vector.load %arg15[%c0_38, %c0_39] : memref<1x128xf32, #tpu.memory_space<vmem>>, vector<1x128xf32>
    %cst_40 = arith.constant dense<0.000000e+00> : vector<16x128xf32>
    %51 = tpu.matmul %48, %49, %cst_40 {dimension_numbers = #tpu.dot_dimension_numbers<[1], [0], [0], [1], [0, 0, 1, 1], [], []>} : vector<16x128xbf16>, vector<128x128xbf16>, vector<16x128xf32> -> vector<16x128xf32>
    %52 = vector.broadcast %50 : vector<1x128xf32> to vector<16x128xf32>
    %53 = arith.addf %51, %52 : vector<16x128xf32>
    %54 = vector.extract_strided_slice %53 {offsets = [0, 0], sizes = [16, 8], strides = [1, 1]} : vector<16x128xf32> to vector<16x8xf32>
    %c0_41 = arith.constant 0 : index
    %c0_42 = arith.constant 0 : index
    %55 = vector.load %arg16[%c0_41, %c0_42] : memref<16x8xf32, #tpu.memory_space<vmem>>, vector<16x8xf32>
    tpu.vector_store %arg16[%c0_41, %c0_42], %54 {strides = array<i32>} : memref<16x8xf32, #tpu.memory_space<vmem>>, vector<16x8xf32>,
    return
  }
  func.func @transform_0(%arg0: i32) -> (i32, i32) {
    %c0_i32 = arith.constant 0 : i32
    %c0_i32_0 = arith.constant 0 : i32
    return %arg0, %c0_i32 : i32, i32
  }
  func.func @transform_1(%arg0: i32) -> (i32, i32) {
    %c0_i32 = arith.constant 0 : i32
    %c0_i32_0 = arith.constant 0 : i32
    %c0_i32_1 = arith.constant 0 : i32
    return %c0_i32, %c0_i32_0 : i32, i32
  }
  func.func @transform_2(%arg0: i32) -> (i32, i32) {
    %c0_i32 = arith.constant 0 : i32
    %c0_i32_0 = arith.constant 0 : i32
    %c0_i32_1 = arith.constant 0 : i32
    return %c0_i32, %c0_i32_0 : i32, i32
  }
  func.func @transform_3(%arg0: i32) -> (i32, i32) {
    %c0_i32 = arith.constant 0 : i32
    %c0_i32_0 = arith.constant 0 : i32
    %c0_i32_1 = arith.constant 0 : i32
    return %c0_i32, %c0_i32_0 : i32, i32
  }
  func.func @transform_4(%arg0: i32) -> (i32, i32) {
    %c0_i32 = arith.constant 0 : i32
    %c0_i32_0 = arith.constant 0 : i32
    %c0_i32_1 = arith.constant 0 : i32
    return %c0_i32, %c0_i32_0 : i32, i32
  }
  func.func @transform_5(%arg0: i32) -> (i32, i32) {
    %c0_i32 = arith.constant 0 : i32
    %c0_i32_0 = arith.constant 0 : i32
    %c0_i32_1 = arith.constant 0 : i32
    return %c0_i32, %c0_i32_0 : i32, i32
  }
  func.func @transform_6(%arg0: i32) -> (i32, i32) {
    %c0_i32 = arith.constant 0 : i32
    %c0_i32_0 = arith.constant 0 : i32
    %c0_i32_1 = arith.constant 0 : i32
    return %c0_i32, %c0_i32_0 : i32, i32
  }
  func.func @transform_7(%arg0: i32) -> (i32, i32) {
    %c0_i32 = arith.constant 0 : i32
    %c0_i32_0 = arith.constant 0 : i32
    %c0_i32_1 = arith.constant 0 : i32
    return %c0_i32, %c0_i32_0 : i32, i32
  }
  func.func @transform_8(%arg0: i32) -> (i32, i32) {
    %c0_i32 = arith.constant 0 : i32
    %c0_i32_0 = arith.constant 0 : i32
    %c0_i32_1 = arith.constant 0 : i32
    return %c0_i32, %c0_i32_0 : i32, i32
  }
  func.func @transform_9(%arg0: i32) -> (i32, i32) {
    %c0_i32 = arith.constant 0 : i32
    %c0_i32_0 = arith.constant 0 : i32
    %c0_i32_1 = arith.constant 0 : i32
    return %c0_i32, %c0_i32_0 : i32, i32
  }
  func.func @transform_10(%arg0: i32) -> (i32, i32) {
    %c0_i32 = arith.constant 0 : i32
    %c0_i32_0 = arith.constant 0 : i32
    %c0_i32_1 = arith.constant 0 : i32
    return %c0_i32, %c0_i32_0 : i32, i32
  }
  func.func @transform_11(%arg0: i32) -> (i32, i32) {
    %c0_i32 = arith.constant 0 : i32
    %c0_i32_0 = arith.constant 0 : i32
    %c0_i32_1 = arith.constant 0 : i32
    return %c0_i32, %c0_i32_0 : i32, i32
  }
  func.func @transform_12(%arg0: i32) -> (i32, i32) {
    %c0_i32 = arith.constant 0 : i32
    %c0_i32_0 = arith.constant 0 : i32
    %c0_i32_1 = arith.constant 0 : i32
    return %c0_i32, %c0_i32_0 : i32, i32
  }
  func.func @transform_13(%arg0: i32) -> (i32, i32) {
    %c0_i32 = arith.constant 0 : i32
    %c0_i32_0 = arith.constant 0 : i32
    %c0_i32_1 = arith.constant 0 : i32
    return %c0_i32, %c0_i32_0 : i32, i32
  }
  func.func @transform_14(%arg0: i32) -> (i32, i32) {
    %c0_i32 = arith.constant 0 : i32
    %c0_i32_0 = arith.constant 0 : i32
    %c0_i32_1 = arith.constant 0 : i32
    return %c0_i32, %c0_i32_0 : i32, i32
  }
  func.func @transform_15(%arg0: i32) -> (i32, i32) {
    %c0_i32 = arith.constant 0 : i32
    %c0_i32_0 = arith.constant 0 : i32
    return %arg0, %c0_i32 : i32, i32
  }
}

</mosaic_0001>

<bundles_post_ra>
// kernel: joint_forward_packed.1
= control target key start
LH: loop header
LB: loop body
LE: loop exit
PB: predicated region body
PF: predicated region fallthrough
CT: control target
= control target key end

     0   :  { %20 = vsyncpa [#allocation3], 0  ;;  %s2256_s0 = inlined_call_operand.vmem [shape: bf16[16,256], index: 0, kind: input, shape index: {}]   ;;  %s2257_s1 = inlined_call_operand.hbm [shape: bf16[256,256], index: 1, kind: input, shape index: {}]   ;;  %s2258_s2 = inlined_call_operand.vmem [shape: f32[1,256], index: 2, kind: input, shape index: {}]   ;;  %s2259_s3 = inlined_call_operand.hbm [shape: bf16[256,256], index: 3, kind: input, shape index: {}]   ;;  %s2260_s4 = inlined_call_operand.vmem [shape: f32[1,256], index: 4, kind: input, shape index: {}]   ;;  %s2261_s5 = inlined_call_operand.hbm [shape: bf16[256,256], index: 5, kind: input, shape index: {}]   ;;  %s2262_s6 = inlined_call_operand.vmem [shape: f32[1,256], index: 6, kind: input, shape index: {}]   ;;  %s2263_s7 = inlined_call_operand.hbm [shape: bf16[256,128], index: 7, kind: input, shape index: {}]   ;;  %s2264_s8 = inlined_call_operand.vmem [shape: f32[1,128], index: 8, kind: input, shape index: {}]   ;;  %s2265_s9 = inlined_call_operand.hbm [shape: bf16[128,128], index: 9, kind: input, shape index: {}]   ;;  %s2266_s10 = inlined_call_operand.vmem [shape: f32[1,128], index: 10, kind: input, shape index: {}]   ;;  %s2267_s11 = inlined_call_operand.hbm [shape: bf16[128,128], index: 11, kind: input, shape index: {}]   ;;  %s2268_s12 = inlined_call_operand.vmem [shape: f32[1,128], index: 12, kind: input, shape index: {}]   ;;  %s2269_s13 = inlined_call_operand.hbm [shape: bf16[128,128], index: 13, kind: input, shape index: {}]   ;;  %s2270_s14 = inlined_call_operand.vmem [shape: f32[1,128], index: 14, kind: input, shape index: {}]   ;;  %s2271_s15 = inlined_call_operand.vmem [shape: f32[16,8], index: 15, kind: output, shape index: {}]  }
   0x1   :  { %21 = vsyncpa [#allocation5], 0 }
   0x2   :  { %22 = vsyncpa [#allocation8], 0 }
   0x3   :  { %23 = vsyncpa [#allocation11], 0  ;;  %s2048_s18 = smov [#allocation4]   ;;  %s2049_s20 = smov [#allocation7]  }
   0x4   :  { %s45_s19 = sshll.u32 %s2048_s18, 4  ;;  %s73_s21 = sshll.u32 %s2049_s20, 4  ;;  %s46_s19 = int_to_ptr.vmem [resolvable:$true] %s45_s19  ;;  %s74_s21 = int_to_ptr.vmem [resolvable:$true] %s73_s21 }
   0x5   :  { %s1908_s22 = scalar_lea.vmem %s46_s19, 4096  ;;  %p1913_p1 = scmp.lt.s32.totalorder %s46_s19, %s46_s19 }
   0x6   :  { %p1909_p0 = scmp.ne.s32.totalorder %s46_s19, %s1908_s22  ;;  %p1914_p2 = scmp.lt.s32.totalorder %s1908_s22, %s1908_s22 }
   0x8   :  { %p1915_p3 = por %p1914_p2, %p1913_p1 }
   0xa   :  { %p1916_p4 = pnand %p1915_p3, %p1909_p0 }
   0xc   :  { %1919 = shalt.err (!%p1916_p4)
}
   0xd   :  { %s2050_s23 = smov 128   ;;  %s2051_s24 = smov 8  }
   0xe   :  { %51 = dma.hbm_to_vmem [thread:$0]  %s2259_s3, 4096, %s46_s19, [#allocation5], %s2050_s23, %s2050_s23, %s2051_s24  }
   0xf   :  { %s1928_s27 = scalar_lea.vmem %s74_s21, 2048  ;;  %p1933_p6 = scmp.lt.s32.totalorder %s74_s21, %s74_s21 }
  0x10   :  { %p1929_p5 = scmp.ne.s32.totalorder %s74_s21, %s1928_s27  ;;  %p1934_p7 = scmp.lt.s32.totalorder %s1928_s27, %s1928_s27 }
  0x12   :  { %p1935_p8 = por %p1934_p7, %p1933_p6 }
  0x14   :  { %p1936_p9 = pnand %p1935_p8, %p1929_p5 }
  0x16   :  { %1939 = shalt.err (!%p1936_p9)
}
  0x17   :  { %s2052_s28 = smov 64   ;;  %s2053_s29 = smov 4  }
  0x18   :  { %79 = dma.hbm_to_vmem [thread:$0]  %s2263_s7, 2048, %s74_s21, [#allocation8], %s2052_s28, %s2052_s28, %s2053_s29  }
  0x19   :  { %s2054_s17 = smov [#allocation10]   ;;  %s2055_s20 = smov [#allocation2]  }
  0x1a   :  { %s101_s18 = sshll.u32 %s2054_s17, 4  ;;  %s31_s3 = sshll.u32 %s2055_s20, 4  ;;  %s102_s18 = int_to_ptr.vmem [resolvable:$true] %s101_s18  ;;  %s32_s3 = int_to_ptr.vmem [resolvable:$true] %s31_s3 }
  0x1b   :  { %s1948_s19 = scalar_lea.vmem %s102_s18, 1024  ;;  %p1953_p11 = scmp.lt.s32.totalorder %s102_s18, %s102_s18 }
  0x1c   :  { %p1949_p10 = scmp.ne.s32.totalorder %s102_s18, %s1948_s19  ;;  %p1954_p12 = scmp.lt.s32.totalorder %s1948_s19, %s1948_s19 }
  0x1e   :  { %p1955_p13 = por %p1954_p12, %p1953_p11 }
  0x20   :  { %p1956_p0 = pnand %p1955_p13, %p1949_p10 }
  0x22   :  { %1959 = shalt.err (!%p1956_p0)
}
  0x23   :  { %107 = dma.hbm_to_vmem [thread:$0]  %s2267_s11, 1024, %s102_s18, [#allocation11], %s2052_s28, %s2052_s28, %s2053_s29  }
  0x24   :  { %s1968_s7 = scalar_lea.vmem %s32_s3, 4096  ;;  %p1973_p2 = scmp.lt.s32.totalorder %s32_s3, %s32_s3 }
  0x25   :  { %p1969_p1 = scmp.ne.s32.totalorder %s32_s3, %s1968_s7  ;;  %p1974_p3 = scmp.lt.s32.totalorder %s1968_s7, %s1968_s7 }
  0x27   :  { %p1975_p4 = por %p1974_p3, %p1973_p2 }
  0x29   :  { %p1976_p5 = pnand %p1975_p4, %p1969_p1 }
  0x2b   :  { %1979 = shalt.err (!%p1976_p5)
}
  0x2c   :  { %37 = dma.hbm_to_vmem [thread:$0]  %s2257_s1, 4096, %s32_s3, [#allocation3], %s2050_s23, %s2050_s23, %s2051_s24  }
  0x2d   :  { %s2056_s27 = smov [#allocation6]   ;;  %s2057_s16 = smov [#allocation9]  }
  0x2e   :  { %s59_s30 = sshll.u32 %s2056_s27, 4  ;;  %s87_s17 = sshll.u32 %s2057_s16, 4  ;;  %s60_s30 = int_to_ptr.vmem [resolvable:$true] %s59_s30  ;;  %s88_s17 = int_to_ptr.vmem [resolvable:$true] %s87_s17 }
  0x2f   :  { %s1988_s11 = scalar_lea.vmem %s60_s30, 4096  ;;  %p1993_p7 = scmp.lt.s32.totalorder %s60_s30, %s60_s30 }
  0x30   :  { %p1989_p6 = scmp.ne.s32.totalorder %s60_s30, %s1988_s11  ;;  %p1994_p8 = scmp.lt.s32.totalorder %s1988_s11, %s1988_s11 }
  0x32   :  { %p1995_p9 = por %p1994_p8, %p1993_p7 }
  0x34   :  { %p1996_p10 = pnand %p1995_p9, %p1989_p6 }
  0x36   :  { %1999 = shalt.err (!%p1996_p10)
}
  0x37   :  { %65 = dma.hbm_to_vmem [thread:$0]  %s2261_s5, 4096, %s60_s30, [#allocation5], %s2050_s23, %s2050_s23, %s2051_s24  }
  0x38   :  { %s2008_s1 = scalar_lea.vmem %s88_s17, 1024  ;;  %p2013_p12 = scmp.lt.s32.totalorder %s88_s17, %s88_s17 }
  0x39   :  { %p2009_p11 = scmp.ne.s32.totalorder %s88_s17, %s2008_s1  ;;  %p2014_p13 = scmp.lt.s32.totalorder %s2008_s1, %s2008_s1 }
  0x3b   :  { %p2015_p0 = por %p2014_p13, %p2013_p12 }
  0x3d   :  { %p2016_p1 = pnand %p2015_p0, %p2009_p11 }
  0x3f   :  { %2019 = shalt.err (!%p2016_p1)
}
  0x40   :  { %93 = dma.hbm_to_vmem [thread:$0]  %s2265_s9, 1024, %s88_s17, [#allocation8], %s2052_s28, %s2052_s28, %s2053_s29  }
  0x41   :  { %s2058_s22 = smov [#allocation12]  }
  0x42   :  { %s115_s25 = sshll.u32 %s2058_s22, 4  ;;  %s116_s25 = int_to_ptr.vmem [resolvable:$true] %s115_s25 }
  0x43   :  { %s2028_s7 = scalar_lea.vmem %s116_s25, 1024  ;;  %p2033_p3 = scmp.lt.s32.totalorder %s116_s25, %s116_s25 }
  0x44   :  { %p2029_p2 = scmp.ne.s32.totalorder %s116_s25, %s2028_s7  ;;  %p2034_p4 = scmp.lt.s32.totalorder %s2028_s7, %s2028_s7 }
  0x46   :  { %p2035_p5 = por %p2034_p4, %p2033_p3 }
  0x48   :  { %p2036_p6 = pnand %p2035_p5, %p2029_p2 }
  0x4a   :  { %2039 = shalt.err (!%p2036_p6)
}
  0x4b   :  { %121 = dma.hbm_to_vmem [thread:$0]  %s2269_s13, 1024, %s116_s25, [#allocation11], %s2052_s28, %s2052_s28, %s2053_s29  }
  0x4c   :  { %2040 = dma.done.wait [#allocation3], 4096  }
  0x4d   :  { %2041 = vsyncadd [#allocation3], 4294963200 }
  0x4e   :  { %2042 = dma.done.wait [#allocation5], 8192  }
  0x4f   :  { %2043 = vsyncadd [#allocation5], 4294959104 }
  0x50   :  { %2044 = dma.done.wait [#allocation8], 3072  }
  0x51   :  { %2045 = vsyncadd [#allocation8], 4294964224 }
  0x52   :  { %2046 = dma.done.wait [#allocation11], 2048  }
  0x53   :  { %2047 = vsyncadd [#allocation11], 4294965248  ;;  %v1713_v0 = vld [vmem:[#allocation2 + $0x74] ss:$8 sps:$4 sm:$0xff]   ;;  %v1715_v1 = vld [vmem:[#allocation2 + $0x70] ss:$8 sps:$4 sm:$0xff]  }
  0x54   :  { %362 = vmatprep.subr.bf16.mxu0 %v1713_v0  ;;  %v1716_v2 = vld [vmem:[#allocation2 + $0x64] ss:$8 sps:$4 sm:$0xff]   ;;  %v1718_v3 = vld [vmem:[#allocation2 + $0x60] ss:$8 sps:$4 sm:$0xff]   ;;  %v1719_v4 = vld [vmem:[#allocation2 + $0x54] ss:$8 sps:$4 sm:$0xff]  }
  0x55   :  { %363 = vmatpush1.bf16.msra.mxu0 %v1715_v1  ;;  %v1721_v5 = vld [vmem:[#allocation2 + $0x50] ss:$8 sps:$4 sm:$0xff]   ;;  %v1722_v6 = vld [vmem:[#allocation2 + $0x44] ss:$8 sps:$4 sm:$0xff]   ;;  %v1724_v7 = vld [vmem:[#allocation2 + $0x40] ss:$8 sps:$4 sm:$0xff]  }
  0x56   :  { %364 = vmatprep.subr.bf16.mxu0 %v1716_v2  ;;  %v1725_v8 = vld [vmem:[#allocation2 + $0x34] ss:$8 sps:$4 sm:$0xff]   ;;  %v1727_v9 = vld [vmem:[#allocation2 + $0x30] ss:$8 sps:$4 sm:$0xff]   ;;  %v1728_v10 = vld [vmem:[#allocation2 + $0x24] ss:$8 sps:$4 sm:$0xff]  }
  0x57   :  { %v1730_v11 = vld [vmem:[#allocation2 + $0x20] ss:$8 sps:$4 sm:$0xff]   ;;  %v1731_v12 = vld [vmem:[#allocation2 + $0x14] ss:$8 sps:$4 sm:$0xff]   ;;  %v1733_v13 = vld [vmem:[#allocation2 + $0x10] ss:$8 sps:$4 sm:$0xff]  }
  0x58   :  { %v1734_v14 = vld [vmem:[#allocation2 + $0x4] ss:$8 sps:$4 sm:$0xff]   ;;  %v1764_v16 = vld [vmem:[#allocation4 + $0x74] ss:$8 sps:$4 sm:$0xff]   ;;  %v1766_v17 = vld [vmem:[#allocation4 + $0x70] ss:$8 sps:$4 sm:$0xff]  }
  0x59   :  { %365 = vmatpush1.bf16.msra.mxu0 %v1718_v3  ;;  %v1763_v15 = vld [vmem:[%s2256_s0 + $0x4] ss:$8 sps:$4 sm:$0xff]   ;;  %615 = vmatprep.subr.bf16.mxu1 %v1764_v16  ;;  %v1769_v19 = vld [vmem:[#allocation4 + $0x60] ss:$8 sps:$4 sm:$0xff]   ;;  %v1770_v21 = vld [vmem:[#allocation4 + $0x54] ss:$8 sps:$4 sm:$0xff]  }
  0x5a   :  { %366 = vmatprep.subr.bf16.mxu0 %v1719_v4  ;;  %394 = vmatprep.mubr.bf16.mxu0 %v1763_v15  ;;  %v1767_v18 = vld [vmem:[#allocation4 + $0x64] ss:$8 sps:$4 sm:$0xff]   ;;  %v1736_v20 = vld [vmem:[#allocation2] ss:$8 sps:$4 sm:$0xff]   ;;  %v1737_v22 = vld [vmem:[#allocation2 + $0xf4] ss:$8 sps:$4 sm:$0xff]  }
  0x5b   :  { %616 = vmatpush1.bf16.msra.mxu1 %v1766_v17  ;;  %v1772_v23 = vld [vmem:[#allocation4 + $0x50] ss:$8 sps:$4 sm:$0xff]   ;;  %v1773_v25 = vld [vmem:[#allocation4 + $0x44] ss:$8 sps:$4 sm:$0xff]   ;;  %v1775_v27 = vld [vmem:[#allocation4 + $0x40] ss:$8 sps:$4 sm:$0xff]  }
  0x5c   :  { %617 = vmatprep.subr.bf16.mxu1 %v1767_v18  ;;  %v1739_v24 = vld [vmem:[#allocation2 + $0xf0] ss:$8 sps:$4 sm:$0xff]   ;;  %v1740_v26 = vld [vmem:[#allocation2 + $0xe4] ss:$8 sps:$4 sm:$0xff]   ;;  %v1742_v28 = vld [vmem:[#allocation2 + $0xe0] ss:$8 sps:$4 sm:$0xff]  }
  0x5d   :  { %367 = vmatpush1.bf16.msra.mxu0 %v1721_v5  ;;  %v1776_v29 = vld [vmem:[#allocation4 + $0x34] ss:$8 sps:$4 sm:$0xff]   ;;  %v1745_v31 = vld [vmem:[#allocation2 + $0xd0] ss:$8 sps:$4 sm:$0xff]   ;;  %v1746_v33 = vld [vmem:[#allocation2 + $0xc4] ss:$8 sps:$4 sm:$0xff]  }
  0x5e   :  { %368 = vmatprep.subr.bf16.mxu0 %v1722_v6  ;;  %v1743_v30 = vld [vmem:[#allocation2 + $0xd4] ss:$8 sps:$4 sm:$0xff]   ;;  %v1778_v32 = vld [vmem:[#allocation4 + $0x30] ss:$8 sps:$4 sm:$0xff]   ;;  %v1779_v34 = vld [vmem:[#allocation4 + $0x24] ss:$8 sps:$4 sm:$0xff]  }
  0x5f   :  { %618 = vmatpush1.bf16.msra.mxu1 %v1769_v19  ;;  %v1781_v35 = vld [vmem:[#allocation4 + $0x20] ss:$8 sps:$4 sm:$0xff]   ;;  %v1782_v37 = vld [vmem:[#allocation4 + $0x14] ss:$8 sps:$4 sm:$0xff]   ;;  %v1784_v39 = vld [vmem:[#allocation4 + $0x10] ss:$8 sps:$4 sm:$0xff]  }
  0x60   :  { %619 = vmatprep.subr.bf16.mxu1 %v1770_v21  ;;  %v1748_v36 = vld [vmem:[#allocation2 + $0xc0] ss:$8 sps:$4 sm:$0xff]   ;;  %v1749_v38 = vld [vmem:[#allocation2 + $0xb4] ss:$8 sps:$4 sm:$0xff]   ;;  %v1751_v40 = vld [vmem:[#allocation2 + $0xb0] ss:$8 sps:$4 sm:$0xff]  }
  0x61   :  { %369 = vmatpush1.bf16.msra.mxu0 %v1724_v7  ;;  %v1785_v41 = vld [vmem:[#allocation4 + $0x4] ss:$8 sps:$4 sm:$0xff]   ;;  %v1787_v43 = vld [vmem:[#allocation4] ss:$8 sps:$4 sm:$0xff]   ;;  %v1788_v45 = vld [vmem:[#allocation4 + $0xf4] ss:$8 sps:$4 sm:$0xff]  }
  0x62   :  { %370 = vmatprep.subr.bf16.mxu0 %v1725_v8  ;;  %v1752_v42 = vld [vmem:[#allocation2 + $0xa4] ss:$8 sps:$4 sm:$0xff]   ;;  %v1754_v44 = vld [vmem:[#allocation2 + $0xa0] ss:$8 sps:$4 sm:$0xff]   ;;  %v1755_v46 = vld [vmem:[#allocation2 + $0x94] ss:$8 sps:$4 sm:$0xff]  }
  0x63   :  { %620 = vmatpush1.bf16.msra.mxu1 %v1772_v23  ;;  %v1790_v47 = vld [vmem:[#allocation4 + $0xf0] ss:$8 sps:$4 sm:$0xff]   ;;  %v1791_v49 = vld [vmem:[#allocation4 + $0xe4] ss:$8 sps:$4 sm:$0xff]   ;;  %v1793_v51 = vld [vmem:[#allocation4 + $0xe0] ss:$8 sps:$4 sm:$0xff]  }
  0x64   :  { %621 = vmatprep.subr.bf16.mxu1 %v1773_v25  ;;  %v1757_v48 = vld [vmem:[#allocation2 + $0x90] ss:$8 sps:$4 sm:$0xff]   ;;  %v1758_v50 = vld [vmem:[#allocation2 + $0x84] ss:$8 sps:$4 sm:$0xff]   ;;  %v1760_v52 = vld [vmem:[#allocation2 + $0x80] ss:$8 sps:$4 sm:$0xff]  }
  0x65   :  { %371 = vmatpush1.bf16.msra.mxu0 %v1727_v9  ;;  %v1794_v53 = vld [vmem:[#allocation4 + $0xd4] ss:$8 sps:$4 sm:$0xff]   ;;  %v1761_v54 = vld [vmem:[%s2256_s0] ss:$8 sps:$4 sm:$0xff]   ;;  %v1796_v55 = vld [vmem:[#allocation4 + $0xd0] ss:$8 sps:$4 sm:$0xff]  }
  0x66   :  { %372 = vmatprep.subr.bf16.mxu0 %v1728_v10  ;;  %v1797_v56 = vld [vmem:[#allocation4 + $0xc4] ss:$8 sps:$4 sm:$0xff]   ;;  %v1799_v57 = vld [vmem:[#allocation4 + $0xc0] ss:$8 sps:$4 sm:$0xff]   ;;  %v1800_v58 = vld [vmem:[#allocation4 + $0xb4] ss:$8 sps:$4 sm:$0xff]  }
  0x67   :  { %622 = vmatpush1.bf16.msra.mxu1 %v1775_v27  ;;  %v1802_v59 = vld [vmem:[#allocation4 + $0xb0] ss:$8 sps:$4 sm:$0xff]   ;;  %v1803_v60 = vld [vmem:[#allocation4 + $0xa4] ss:$8 sps:$4 sm:$0xff]   ;;  %v1805_v61 = vld [vmem:[#allocation4 + $0xa0] ss:$8 sps:$4 sm:$0xff]  }
  0x68   :  { %623 = vmatprep.subr.bf16.mxu1 %v1776_v29  ;;  %v1806_v62 = vld [vmem:[#allocation4 + $0x94] ss:$8 sps:$4 sm:$0xff]   ;;  %v1808_v63 = vld [vmem:[#allocation4 + $0x90] ss:$8 sps:$4 sm:$0xff]   ;;  %v1809_v0 = vld [vmem:[#allocation4 + $0x84] ss:$8 sps:$4 sm:$0xff]  }
  0x69   :  { %373 = vmatpush1.bf16.msra.mxu0 %v1730_v11  ;;  %v1811_v1 = vld [vmem:[#allocation4 + $0x80] ss:$8 sps:$4 sm:$0xff]   ;;  %v1812_v2 = vld [vmem:[#allocation6 + $0x70] ss:$8 sps:$4 sm:$0xff]   ;;  %v1814_v3 = vld [vmem:[#allocation6 + $0x74] ss:$8 sps:$4 sm:$0xff]  }
  0x6a   :  { %374 = vmatprep.subr.bf16.mxu0 %v1731_v12  ;;  %v1817_v4 = vld [vmem:[#allocation6 + $0x64] ss:$8 sps:$4 sm:$0xff]   ;;  %v1815_v5 = vld [vmem:[#allocation6 + $0x60] ss:$8 sps:$4 sm:$0xff]   ;;  %v1820_v6 = vld [vmem:[#allocation6 + $0x54] ss:$8 sps:$4 sm:$0xff]  }
  0x6b   :  { %624 = vmatpush1.bf16.msra.mxu1 %v1778_v32  ;;  %v1818_v7 = vld [vmem:[#allocation6 + $0x50] ss:$8 sps:$4 sm:$0xff]   ;;  %v1823_v8 = vld [vmem:[#allocation6 + $0x44] ss:$8 sps:$4 sm:$0xff]   ;;  %v1821_v9 = vld [vmem:[#allocation6 + $0x40] ss:$8 sps:$4 sm:$0xff]  }
  0x6c   :  { %625 = vmatprep.subr.bf16.mxu1 %v1779_v34  ;;  %v1826_v10 = vld [vmem:[#allocation6 + $0x34] ss:$8 sps:$4 sm:$0xff]   ;;  %v1824_v11 = vld [vmem:[#allocation6 + $0x30] ss:$8 sps:$4 sm:$0xff]   ;;  %v1829_v12 = vld [vmem:[#allocation6 + $0x24] ss:$8 sps:$4 sm:$0xff]  }
  0x6d   :  { %375 = vmatpush1.bf16.msra.mxu0 %v1733_v13  ;;  %v1827_v13 = vld [vmem:[#allocation6 + $0x20] ss:$8 sps:$4 sm:$0xff]   ;;  %v1830_v15 = vld [vmem:[#allocation6 + $0x10] ss:$8 sps:$4 sm:$0xff]   ;;  %v1835_v16 = vld [vmem:[#allocation6 + $0x4] ss:$8 sps:$4 sm:$0xff]  }
  0x6e   :  { %376 = vmatprep.subr.bf16.mxu0 %v1734_v14  ;;  %v1832_v14 = vld [vmem:[#allocation6 + $0x14] ss:$8 sps:$4 sm:$0xff]   ;;  %v1833_v17 = vld [vmem:[#allocation6] ss:$8 sps:$4 sm:$0xff]   ;;  %v1836_v19 = vld [vmem:[#allocation6 + $0xf0] ss:$8 sps:$4 sm:$0xff]  }
  0x6f   :  { %626 = vmatpush1.bf16.msra.mxu1 %v1781_v35  ;;  %v1838_v18 = vld [vmem:[#allocation6 + $0xf4] ss:$8 sps:$4 sm:$0xff]   ;;  %v1839_v21 = vld [vmem:[#allocation6 + $0xe0] ss:$8 sps:$4 sm:$0xff]   ;;  %v1842_v23 = vld [vmem:[#allocation6 + $0xd0] ss:$8 sps:$4 sm:$0xff]  }
  0x70   :  { %627 = vmatprep.subr.bf16.mxu1 %v1782_v37  ;;  %v1845_v25 = vld [vmem:[#allocation6 + $0xc0] ss:$8 sps:$4 sm:$0xff]   ;;  %v1848_v27 = vld [vmem:[#allocation6 + $0xb0] ss:$8 sps:$4 sm:$0xff]   ;;  %vm2060_vm0 = vmmov 0   ;;  %vm1438_vm1 = vcmask 64512  }
  0x71   :  { %377 = vmatpush1.bf16.msra.mxu0 %v1736_v20  ;;  %v1841_v20 = vld [vmem:[#allocation6 + $0xe4] ss:$8 sps:$4 sm:$0xff]   ;;  %v180_v32 = vld [vmem:[%s2258_s2] sm:$0x3] }
  0x72   :  { %378 = vmatprep.subr.bf16.mxu0 %v1737_v22  ;;  %v1844_v22 = vld [vmem:[#allocation6 + $0xd4] ss:$8 sps:$4 sm:$0xff]  }
  0x73   :  { %628 = vmatpush1.bf16.msra.mxu1 %v1784_v39 }
  0x74   :  { %629 = vmatprep.subr.bf16.mxu1 %v1785_v41 }
  0x75   :  { %379 = vmatpush2.bf16.msra.mxu0 %v1739_v24  ;;  %v1847_v24 = vld [vmem:[#allocation6 + $0xc4] ss:$8 sps:$4 sm:$0xff]  }
  0x76   :  { %380 = vmatprep.subr.bf16.mxu0 %v1740_v26  ;;  %v1850_v26 = vld [vmem:[#allocation6 + $0xb4] ss:$8 sps:$4 sm:$0xff]  }
  0x77   :  { %630 = vmatpush1.bf16.msra.mxu1 %v1787_v43 }
  0x78   :  { %631 = vmatprep.subr.bf16.mxu1 %v1788_v45 }
  0x79   :  { %381 = vmatpush2.bf16.msra.mxu0 %v1742_v28  ;;  %v182_v28 = vlaneseq }
  0x7a   :  { %382 = vmatprep.subr.bf16.mxu0 %v1743_v30 }
  0x7b   :  { %632 = vmatpush2.bf16.msra.mxu1 %v1790_v47  ;;  %v183_v29 = vshrl.u32 %v182_v28, 7 }
  0x7c   :  { %633 = vmatprep.subr.bf16.mxu1 %v1791_v49  ;;  %v1853_v49 = vld [vmem:[#allocation6 + $0xa4] ss:$8 sps:$4 sm:$0xff]  }
  0x7d   :  { %383 = vmatpush2.bf16.msra.mxu0 %v1745_v31  ;;  %v2189_v30 = vsub.s32 1, %v183_v29  ;;  %v2191_v31 = vsub.s32 0, %v183_v29 }
  0x7e   :  { %384 = vmatprep.subr.bf16.mxu0 %v1746_v33 }
  0x7f   :  { %634 = vmatpush2.bf16.msra.mxu1 %v1793_v51  ;;  %v189_v34 = vrot.slane %v180_v32, %v2189_v30  ;;  %v185_v35 = vrot.slane %v180_v32, %v2191_v31  ;;  %v1856_v51 = vld [vmem:[#allocation6 + $0x94] ss:$8 sps:$4 sm:$0xff]  }
  0x80   :  { %635 = vmatprep.subr.bf16.mxu1 %v1794_v53  ;;  %v1859_v53 = vld [vmem:[#allocation6 + $0x84] ss:$8 sps:$4 sm:$0xff]  }
  0x81   :  { %385 = vmatpush2.bf16.msra.mxu0 %v1748_v36 }
  0x82   :  { %386 = vmatprep.subr.bf16.mxu0 %v1749_v38 }
  0x83   :  { %636 = vmatpush2.bf16.msra.mxu1 %v1796_v55  ;;  %v1860_v55 = vld [vmem:[#allocation7 + $0x78] sm:$0xff]  }
  0x84   :  { %637 = vmatprep.subr.bf16.mxu1 %v1797_v56  ;;  %v1861_v56 = vld [vmem:[#allocation7 + $0x38] sm:$0xff]  }
  0x85   :  { %387 = vmatpush2.bf16.msra.mxu0 %v1751_v40 }
  0x86   :  { %388 = vmatprep.subr.bf16.mxu0 %v1752_v42 }
  0x87   :  { %638 = vmatpush2.bf16.msra.mxu1 %v1799_v57  ;;  %v1862_v57 = vld [vmem:[#allocation7 + $0x70] sm:$0xff]  }
  0x88   :  { %639 = vmatprep.subr.bf16.mxu1 %v1800_v58  ;;  %v1863_v58 = vld [vmem:[#allocation7 + $0x30] sm:$0xff]  }
  0x89   :  { %389 = vmatpush2.bf16.msra.mxu0 %v1754_v44 }
  0x8a   :  { %390 = vmatprep.subr.bf16.mxu0 %v1755_v46 }
  0x8b   :  { %640 = vmatpush2.bf16.msra.mxu1 %v1802_v59  ;;  %v1864_v59 = vld [vmem:[#allocation7 + $0x68] sm:$0xff]  }
  0x8c   :  { %641 = vmatprep.subr.bf16.mxu1 %v1803_v60  ;;  %v1865_v60 = vld [vmem:[#allocation7 + $0x28] sm:$0xff]  }
  0x8d   :  { %391 = vmatpush2.bf16.msra.mxu0 %v1757_v48 }
  0x8e   :  { %392 = vmatprep.subr.bf16.mxu0 %v1758_v50  ;;  %v1851_v50 = vld [vmem:[#allocation6 + $0xa0] ss:$8 sps:$4 sm:$0xff]  }
  0x8f   :  { %642 = vmatpush2.bf16.msra.mxu1 %v1805_v61  ;;  %v1866_v61 = vld [vmem:[#allocation7 + $0x60] sm:$0xff]  }
  0x90   :  { %643 = vmatprep.subr.bf16.mxu1 %v1806_v62  ;;  %v1867_v62 = vld [vmem:[#allocation7 + $0x20] sm:$0xff]  }
  0x91   :  { %393 = vmatpush2.bf16.msra.mxu0 %v1760_v52  ;;  %v1854_v52 = vld [vmem:[#allocation6 + $0x90] ss:$8 sps:$4 sm:$0xff]  }
  0x92   :  { %868 = vmatprep.subr.bf16.mxu0 %v1814_v3 }
  0x93   :  { %644 = vmatpush2.bf16.msra.mxu1 %v1808_v63  ;;  %v1868_v63 = vld [vmem:[#allocation7 + $0x58] sm:$0xff]  }
  0x94   :  { %395 = vmatmul.mubr.bf16.vlgmr.msra.gmra.mxu0 %v1761_v54  ;;  %645 = vmatprep.subr.bf16.mxu1 %v1809_v0  ;;  %v1857_v54 = vld [vmem:[#allocation6 + $0x80] ss:$8 sps:$4 sm:$0xff]   ;;  %v1869_v0 = vld [vmem:[#allocation7 + $0x18] sm:$0xff]  }
  0x95   :  { %869 = vmatpush1.bf16.msra.mxu0 %v1812_v2 }
  0x96   :  { %870 = vmatprep.subr.bf16.mxu0 %v1817_v4 }
  0x97   :  { %646 = vmatpush2.bf16.msra.mxu1 %v1811_v1  ;;  %v443_v1 = vld [vmem:[%s2260_s4] sm:$0x3] }
  0x98   :  { %1591 = vmatprep.subr.bf16.mxu1 %v1860_v55  ;;  %v452_v3 = vrot.slane %v443_v1, %v2189_v30  ;;  %v448_v4 = vrot.slane %v443_v1, %v2191_v31 }
  0x99   :  { %871 = vmatpush1.bf16.msra.mxu0 %v1815_v5 }
  0x9a   :  { %872 = vmatprep.subr.bf16.mxu0 %v1820_v6 }
  0x9d   :  { %873 = vmatpush1.bf16.msra.mxu0 %v1818_v7 }
  0x9e   :  { %874 = vmatprep.subr.bf16.mxu0 %v1823_v8 }
  0xa1   :  { %875 = vmatpush1.bf16.msra.mxu0 %v1821_v9 }
  0xa2   :  { %876 = vmatprep.subr.bf16.mxu0 %v1826_v10 }
  0xa5   :  { %877 = vmatpush1.bf16.msra.mxu0 %v1824_v11 }
  0xa6   :  { %878 = vmatprep.subr.bf16.mxu0 %v1829_v12 }
  0xa9   :  { %879 = vmatpush1.bf16.msra.mxu0 %v1827_v13 }
  0xaa   :  { %880 = vmatprep.subr.bf16.mxu0 %v1832_v14 }
  0xad   :  { %881 = vmatpush1.bf16.msra.mxu0 %v1830_v15 }
  0xae   :  { %882 = vmatprep.subr.bf16.mxu0 %v1835_v16 }
  0xb1   :  { %883 = vmatpush1.bf16.msra.mxu0 %v1833_v17 }
  0xb2   :  { %884 = vmatprep.subr.bf16.mxu0 %v1838_v18  ;;  %v1870_v18 = vld [vmem:[#allocation7 + $0x50] sm:$0xff]  }
  0xb5   :  { %885 = vmatpush2.bf16.msra.mxu0 %v1836_v19  ;;  %v1871_v19 = vld [vmem:[#allocation7 + $0x10] sm:$0xff]  }
  0xb6   :  { %886 = vmatprep.subr.bf16.mxu0 %v1841_v20  ;;  %v1872_v20 = vld [vmem:[#allocation7 + $0x48] sm:$0xff]  }
  0xb9   :  { %887 = vmatpush2.bf16.msra.mxu0 %v1839_v21  ;;  %v1873_v21 = vld [vmem:[#allocation7 + $0x8] sm:$0xff]  }
  0xba   :  { %888 = vmatprep.subr.bf16.mxu0 %v1844_v22  ;;  %v1874_v22 = vld [vmem:[#allocation7 + $0x40] sm:$0xff]  }
  0xbd   :  { %889 = vmatpush2.bf16.msra.mxu0 %v1842_v23  ;;  %v1875_v23 = vld [vmem:[#allocation7] sm:$0xff]  }
  0xbe   :  { %890 = vmatprep.subr.bf16.mxu0 %v1847_v24  ;;  %v2059_v24 = vmov 0.0  }
  0xc1   :  { %891 = vmatpush2.bf16.msra.mxu0 %v1845_v25  ;;  %v696_v25 = vld [vmem:[%s2262_s6] sm:$0x3] }
  0xc2   :  { %892 = vmatprep.subr.bf16.mxu0 %v1850_v26  ;;  %v701_v28 = vrot.slane %v696_v25, %v2191_v31  ;;  %v1878_v31 = vld [vmem:[#allocation9 + $0x28] sm:$0xff]  }
  0xc5   :  { %893 = vmatpush2.bf16.msra.mxu0 %v1848_v27  ;;  %v705_v27 = vrot.slane %v696_v25, %v2189_v30  ;;  %v1877_v30 = vld [vmem:[#allocation9 + $0x30] sm:$0xff]   ;;  %v1573_v25 = vld [vmem:[%s2268_s12] ss:$0 sm:$0xff] }
  0xc6   :  { %894 = vmatprep.subr.bf16.mxu0 %v1853_v49  ;;  %v1883_v49 = vld [vmem:[#allocation9] sm:$0xff]  }
  0xc9   :  { %895 = vmatpush2.bf16.msra.mxu0 %v1851_v50  ;;  %v1884_v50 = vld [vmem:[#allocation10 + $0x38] sm:$0xff]  }
  0xca   :  { %896 = vmatprep.subr.bf16.mxu0 %v1856_v51  ;;  %v1885_v51 = vld [vmem:[#allocation10 + $0x30] sm:$0xff]  }
  0xcd   :  { %897 = vmatpush2.bf16.msra.mxu0 %v1854_v52  ;;  %v1886_v52 = vld [vmem:[#allocation10 + $0x28] sm:$0xff]  }
  0xce   :  { %898 = vmatprep.subr.bf16.mxu0 %v1859_v53  ;;  %v1887_v53 = vld [vmem:[#allocation10 + $0x20] sm:$0xff]  }
  0xd1   :  { %899 = vmatpush2.bf16.msra.mxu0 %v1857_v54  ;;  %v1888_v54 = vld [vmem:[#allocation10 + $0x18] sm:$0xff]  }
  0xd2   :  { %1660 = vmatprep.subr.bf16.mxu0 %v2059_v24 }
 0x154   :  { %v396_v33 = vpop.f32.mrf.mxu0 }
 0x155   :  { %v397_v40 = vadd.f32 %v396_v33, %v185_v35 }
 0x156   :  { %v398_v36 = vpop.f32.mrf.mxu0 }
 0x157   :  { %v399_v38 = vadd.f32 %v398_v36, %v189_v34  ;;  %v405_v46 = vmax.f32 %v397_v40, 0.0 }
 0x158   :  { %v400_v37 = vpop.f32.mrf.mxu0 }
 0x159   :  { %v401_v39 = vadd.f32 %v400_v37, %v185_v35  ;;  %v406_v44 = vmax.f32 %v399_v38, 0.0 }
 0x15a   :  { %v402_v41 = vpop.f32.mrf.mxu0 }
 0x15b   :  { %v403_v42 = vadd.f32 %v402_v41, %v189_v34  ;;  %v407_v43 = vmax.f32 %v401_v39, 0.0 }
 0x15d   :  { %v408_v45 = vmax.f32 %v403_v42, 0.0  ;;  %v409_v48 = vpack.c.bf16 %v407_v43, %v405_v46  ;;  %v1876_v43 = vld [vmem:[#allocation9 + $0x38] sm:$0xff]  }
 0x15e   :  { %v1880_v46 = vld [vmem:[#allocation9 + $0x18] sm:$0xff]  }
 0x15f   :  { %v410_v47 = vpack.c.bf16 %v408_v45, %v406_v44  ;;  %v1879_v45 = vld [vmem:[#allocation9 + $0x20] sm:$0xff]  }
 0x161   :  { %647 = vmatprep.mubr.bf16.mxu1 %v410_v47  ;;  %v1881_v47 = vld [vmem:[#allocation9 + $0x10] sm:$0xff]  }
 0x162   :  { %648 = vmatmul.mubr.bf16.vlgmr.msra.gmra.mxu1 %v409_v48  ;;  %v1882_v48 = vld [vmem:[#allocation9 + $0x8] sm:$0xff]  }
 0x163   :  { %1592 = vmatpush3.bf16.msra.mxu1 %v1861_v56 }
 0x164   :  { %1593 = vmatprep.subr.bf16.mxu1 %v1862_v57 }
 0x167   :  { %1594 = vmatpush3.bf16.msra.mxu1 %v1863_v58  ;;  %v1547_v58 = vld [vmem:[%s2264_s8] ss:$0 sm:$0xff] }
 0x168   :  { %1595 = vmatprep.subr.bf16.mxu1 %v1864_v59 }
 0x16b   :  { %1596 = vmatpush3.bf16.msra.mxu1 %v1865_v60 }
 0x16c   :  { %1597 = vmatprep.subr.bf16.mxu1 %v1866_v61 }
 0x16f   :  { %1598 = vmatpush3.bf16.msra.mxu1 %v1867_v62 }
 0x170   :  { %1599 = vmatprep.subr.bf16.mxu1 %v1868_v63 }
 0x173   :  { %1600 = vmatpush3.bf16.msra.mxu1 %v1869_v0 }
 0x174   :  { %1601 = vmatprep.subr.bf16.mxu1 %v1870_v18 }
 0x177   :  { %1602 = vmatpush3.bf16.msra.mxu1 %v1871_v19 }
 0x178   :  { %1603 = vmatprep.subr.bf16.mxu1 %v1872_v20 }
 0x17b   :  { %1604 = vmatpush3.bf16.msra.mxu1 %v1873_v21  ;;  %v1897_v21 = vld [vmem:[#allocation12 + $0x10] sm:$0xff]  }
 0x17c   :  { %1605 = vmatprep.subr.bf16.mxu1 %v1874_v22  ;;  %v1898_v22 = vld [vmem:[#allocation12 + $0x8] sm:$0xff]  }
 0x17f   :  { %1606 = vmatpush3.bf16.msra.mxu1 %v1875_v23  ;;  %v1899_v23 = vld [vmem:[#allocation12] sm:$0xff]  }
 0x180   :  { %1640 = vmatprep.subr.bf16.mxu1 %v2059_v24 }
 0x222   :  { %v649_v2 = vpop.f32.mrf.mxu1 }
 0x223   :  { %v650_v9 = vadd.f32 %v649_v2, %v448_v4 }
 0x224   :  { %v651_v5 = vpop.f32.mrf.mxu1 }
 0x225   :  { %v652_v7 = vadd.f32 %v651_v5, %v452_v3  ;;  %v658_v15 = vmax.f32 %v650_v9, 0.0  ;;  %v1891_v5 = vld [vmem:[#allocation10] sm:$0xff]  }
 0x226   :  { %v653_v6 = vpop.f32.mrf.mxu1  ;;  %v1895_v9 = vld [vmem:[#allocation12 + $0x20] sm:$0xff]  }
 0x227   :  { %v654_v8 = vadd.f32 %v653_v6, %v448_v4  ;;  %v659_v13 = vmax.f32 %v652_v7, 0.0  ;;  %v1890_v4 = vld [vmem:[#allocation10 + $0x8] sm:$0xff]   ;;  %v1892_v6 = vld [vmem:[#allocation12 + $0x38] sm:$0xff]   ;;  %v1893_v7 = vld [vmem:[#allocation12 + $0x30] sm:$0xff]  }
 0x228   :  { %v655_v10 = vpop.f32.mrf.mxu1 }
 0x229   :  { %v656_v11 = vadd.f32 %v655_v10, %v452_v3  ;;  %v660_v12 = vmax.f32 %v654_v8, 0.0  ;;  %v1889_v3 = vld [vmem:[#allocation10 + $0x10] sm:$0xff]   ;;  %v1894_v8 = vld [vmem:[#allocation12 + $0x28] sm:$0xff]   ;;  %v1896_v10 = vld [vmem:[#allocation12 + $0x18] sm:$0xff]  }
 0x22b   :  { %v661_v14 = vmax.f32 %v656_v11, 0.0  ;;  %v662_v17 = vpack.c.bf16 %v660_v12, %v658_v15  ;;  %v1564_v11 = vld [vmem:[%s2266_s10] ss:$0 sm:$0xff] }
 0x22d   :  { %v663_v16 = vpack.c.bf16 %v661_v14, %v659_v13 }
 0x22f   :  { %900 = vmatprep.mubr.bf16.mxu0 %v663_v16 }
 0x230   :  { %901 = vmatmul.mubr.bf16.vlgmr.msra.gmra.mxu0 %v662_v17 }
 0x231   :  { %1676 = vmatprep.mubr.msk.bf16.mxu0 %vm2060_vm0, %v2059_v24  ;;  %1661 = vmatpush3.bf16.msra.mxu0 %v1884_v50 }
 0x232   :  { %1662 = vmatprep.subr.bf16.mxu0 %v2059_v24 }
 0x235   :  { %1663 = vmatpush3.bf16.msra.mxu0 %v1885_v51 }
 0x236   :  { %1664 = vmatprep.subr.bf16.mxu0 %v2059_v24 }
 0x239   :  { %1665 = vmatpush3.bf16.msra.mxu0 %v1886_v52 }
 0x23a   :  { %1666 = vmatprep.subr.bf16.mxu0 %v2059_v24 }
 0x23d   :  { %1667 = vmatpush3.bf16.msra.mxu0 %v1887_v53 }
 0x23e   :  { %1668 = vmatprep.subr.bf16.mxu0 %v2059_v24 }
 0x241   :  { %1669 = vmatpush3.bf16.msra.mxu0 %v1888_v54 }
 0x242   :  { %1670 = vmatprep.subr.bf16.mxu0 %v2059_v24 }
 0x245   :  { %1671 = vmatpush3.bf16.msra.mxu0 %v1889_v3 }
 0x246   :  { %1672 = vmatprep.subr.bf16.mxu0 %v2059_v24 }
 0x249   :  { %1673 = vmatpush3.bf16.msra.mxu0 %v1890_v4 }
 0x24a   :  { %1674 = vmatprep.subr.bf16.mxu0 %v2059_v24 }
 0x24d   :  { %1675 = vmatpush3.bf16.msra.mxu0 %v1891_v5 }
 0x2f0   :  { %v902_v26 = vpop.f32.mrf.mxu0 }
 0x2f1   :  { %v903_v35 = vadd.f32 %v902_v26, %v701_v28 }
 0x2f2   :  { %v904_v29 = vpop.f32.mrf.mxu0 }
 0x2f3   :  { %v905_v33 = vadd.f32 %v904_v29, %v705_v27  ;;  %v911_v41 = vmax.f32 %v903_v35, 0.0 }
 0x2f4   :  { %v906_v32 = vpop.f32.mrf.mxu0 }
 0x2f5   :  { %v907_v34 = vadd.f32 %v906_v32, %v701_v28  ;;  %v912_v39 = vmax.f32 %v905_v33, 0.0 }
 0x2f6   :  { %v908_v36 = vpop.f32.mrf.mxu0 }
 0x2f7   :  { %v909_v37 = vadd.f32 %v908_v36, %v705_v27  ;;  %v913_v38 = vmax.f32 %v907_v34, 0.0 }
 0x2f9   :  { %v914_v40 = vmax.f32 %v909_v37, 0.0  ;;  %v915_v44 = vpack.c.bf16 %v913_v38, %v911_v41 }
 0x2fb   :  { %v916_v42 = vpack.c.bf16 %v914_v40, %v912_v39 }
 0x2fd   :  { %1084 = vmatprep.mubr.bf16.mxu1 %v916_v42 }
 0x2fe   :  { %1085 = vmatmul.mubr.bf16.vlgmr.msra.gmra.mxu1 %v915_v44 }
 0x2ff   :  { %1641 = vmatpush3.bf16.msra.mxu1 %v1876_v43  ;;  %1656 = vmatprep.mubr.msk.bf16.mxu1 %vm2060_vm0, %v2059_v24 }
 0x300   :  { %1642 = vmatprep.subr.bf16.mxu1 %v2059_v24 }
 0x303   :  { %1643 = vmatpush3.bf16.msra.mxu1 %v1877_v30 }
 0x304   :  { %1644 = vmatprep.subr.bf16.mxu1 %v2059_v24 }
 0x307   :  { %1645 = vmatpush3.bf16.msra.mxu1 %v1878_v31 }
 0x308   :  { %1646 = vmatprep.subr.bf16.mxu1 %v2059_v24 }
 0x30b   :  { %1647 = vmatpush3.bf16.msra.mxu1 %v1879_v45 }
 0x30c   :  { %1648 = vmatprep.subr.bf16.mxu1 %v2059_v24 }
 0x30f   :  { %1649 = vmatpush3.bf16.msra.mxu1 %v1880_v46 }
 0x310   :  { %1650 = vmatprep.subr.bf16.mxu1 %v2059_v24 }
 0x313   :  { %1651 = vmatpush3.bf16.msra.mxu1 %v1881_v47 }
 0x314   :  { %1652 = vmatprep.subr.bf16.mxu1 %v2059_v24 }
 0x317   :  { %1653 = vmatpush3.bf16.msra.mxu1 %v1882_v48 }
 0x318   :  { %1654 = vmatprep.subr.bf16.mxu1 %v2059_v24 }
 0x31b   :  { %1655 = vmatpush3.bf16.msra.mxu1 %v1883_v49 }
 0x31c   :  { %1680 = vmatprep.subr.bf16.mxu1 %v2059_v24 }
 0x3be   :  { %v1607_v55 = vpop.f32.mrf.mxu1 }
 0x3c0   :  { %v1608_v56 = vpop.f32.mrf.mxu1 }
 0x3c1   :  { %v1609_v57 = vadd.f32 %v1608_v56, %v1607_v55 }
 0x3c2   :  { %v1610_v59 = vpop.f32.mrf.mxu1 }
 0x3c3   :  { %v1087_v61 = vadd.f32 %v1609_v57, %v1547_v58 }
 0x3c4   :  { %v1611_v60 = vpop.f32.mrf.mxu1 }
 0x3c5   :  { %v1612_v62 = vadd.f32 %v1611_v60, %v1610_v59  ;;  %v1093_v0 = vmax.f32 %v1087_v61, 0.0 }
 0x3c7   :  { %v1090_v63 = vadd.f32 %v1612_v62, %v1547_v58 }
 0x3c9   :  { %v1094_v1 = vmax.f32 %v1090_v63, 0.0 }
 0x3cb   :  { %v1095_v2 = vpack.c.bf16 %v1094_v1, %v1093_v0 }
 0x3cd   :  { %1657 = vmatmul.mubr.bf16.vlgmr.msra.gmra.mxu1 %v1095_v2 }
 0x3ce   :  { %1696 = vmatprep.mubr.msk.bf16.mxu1 %vm2060_vm0, %v2059_v24  ;;  %1681 = vmatpush3.bf16.msra.mxu1 %v1892_v6 }
 0x3cf   :  { %1682 = vmatprep.subr.bf16.mxu1 %v2059_v24 }
 0x3d2   :  { %1683 = vmatpush3.bf16.msra.mxu1 %v1893_v7 }
 0x3d3   :  { %1684 = vmatprep.subr.bf16.mxu1 %v2059_v24 }
 0x3d6   :  { %1685 = vmatpush3.bf16.msra.mxu1 %v1894_v8 }
 0x3d7   :  { %1686 = vmatprep.subr.bf16.mxu1 %v2059_v24 }
 0x3da   :  { %1687 = vmatpush3.bf16.msra.mxu1 %v1895_v9 }
 0x3db   :  { %1688 = vmatprep.subr.bf16.mxu1 %v2059_v24 }
 0x3de   :  { %1689 = vmatpush3.bf16.msra.mxu1 %v1896_v10 }
 0x3df   :  { %1690 = vmatprep.subr.bf16.mxu1 %v2059_v24 }
 0x3e2   :  { %1691 = vmatpush3.bf16.msra.mxu1 %v1897_v21 }
 0x3e3   :  { %1692 = vmatprep.subr.bf16.mxu1 %v2059_v24 }
 0x3e6   :  { %1693 = vmatpush3.bf16.msra.mxu1 %v1898_v22 }
 0x3e7   :  { %1694 = vmatprep.subr.bf16.mxu1 %v2059_v24  ;;  %v1582_v24 = vld [vmem:[%s2270_s14] ss:$0 sm:$0xff] }
 0x3ea   :  { %1695 = vmatpush3.bf16.msra.mxu1 %v1899_v23 }
 0x48d   :  { %v1201_v12 = vpop.f32.mrf.mxu1 }
 0x48e   :  { %v1202_v14 = vadd.f32 %v1564_v11, %v1201_v12 }
 0x48f   :  { %v1658_v13 = vpop.f32.mrf.mxu1 }
 0x490   :  { %v1208_v18 = vmax.f32 %v1202_v14, 0.0 }
 0x491   :  { %v1204_v15 = vpop.f32.mrf.mxu1 }
 0x492   :  { %v1205_v16 = vadd.f32 %v1564_v11, %v1204_v15 }
 0x493   :  { %v1659_v17 = vpop.f32.mrf.mxu1 }
 0x494   :  { %v1209_v19 = vmax.f32 %v1205_v16, 0.0 }
 0x496   :  { %v1210_v20 = vpack.c.bf16 %v1209_v19, %v1208_v18 }
 0x498   :  { %1677 = vmatmul.mubr.bf16.vlgmr.msra.gmra.mxu0 %v1210_v20 }
 0x558   :  { %v1316_v26 = vpop.f32.mrf.mxu0 }
 0x559   :  { %v1317_v28 = vadd.f32 %v1573_v25, %v1316_v26 }
 0x55a   :  { %v1678_v27 = vpop.f32.mrf.mxu0 }
 0x55b   :  { %v1323_v34 = vmax.f32 %v1317_v28, 0.0 }
 0x55c   :  { %v1319_v29 = vpop.f32.mrf.mxu0 }
 0x55d   :  { %v1320_v32 = vadd.f32 %v1573_v25, %v1319_v29 }
 0x55e   :  { %v1679_v33 = vpop.f32.mrf.mxu0 }
 0x55f   :  { %v1324_v35 = vmax.f32 %v1320_v32, 0.0 }
 0x561   :  { %v1325_v36 = vpack.c.bf16 %v1324_v35, %v1323_v34 }
 0x563   :  { %1697 = vmatmul.mubr.bf16.vlgmr.msra.gmra.mxu1 %v1325_v36 }
 0x623   :  { %v1431_v37 = vpop.f32.mrf.mxu1 }
 0x624   :  { %v1432_v38 = vadd.f32 %v1582_v24, %v1431_v37 }
 0x625   :  { %v1698_v39 = vpop.f32.mrf.mxu1 }
 0x626   :  { %1439 = vst.msk [vmem:[%s2271_s15] sm:$0xff] %vm1438_vm1, %v1432_v38 }
 0x627   :  { %v1434_v40 = vpop.f32.mrf.mxu1 }
 0x628   :  { %v1435_v41 = vadd.f32 %v1582_v24, %v1434_v40 }
 0x629   :  { %v1699_v42 = vpop.f32.mrf.mxu1 }
 0x62a   :  { %1440 = vst.msk [vmem:[%s2271_s15 + $0x8] sm:$0xff] %vm1438_vm1, %v1435_v41 }
 0x62b   :  { %1445 = vsyncpa [#allocation3], 1 }
 0x62c   :  { %1446 = vsyncpa [#allocation5], 1 }
 0x62d   :  { %1447 = vsyncpa [#allocation8], 1 }
 0x62e   :  { %1448 = vsyncpa [#allocation11], 1 }

</bundles_post_ra>
